<compile_context>
chip_gen: v7x
topology: tpu7x:2x2x1
jax: 0.10.0
libtpu: 0.0.40
codegen_flags: <defaults>
</compile_context>

<pallas_src>
from functools import partial

import jax
import jax.numpy as jnp
from jax.experimental import pallas as pl
from jax.experimental.pallas import tpu as pltpu

_EPS = 1e-5


# ----------------------------------------------------------------------------
# Pallas kernel
# ----------------------------------------------------------------------------
def _mobileone_kernel(x_ref, w_ref, b_ref, m_ref, o_ref, xp_ref,
                      *, H, W, K, PAD, PADA):
    """One grid step = one batch image.

    x_ref : (1, Cin, L)         unpadded, spatially-flattened input image
    w_ref : (K*K, Cout, Cin)    reparameterized (branch-summed, BN-folded) weights
                                (bf16 for the MXU; grid-constant block)
    b_ref : (Cout, 1)           reparameterized bias (f32)
    m_ref : (K, L)              per-kw horizontal validity masks (exact 0/1, f32)
    o_ref : (1, Cout, L)        output block; last dim L is lane-dense
    xp_ref: (Cin, PADA+L+PADA)  f32 scratch: image flanked by 128-aligned zero halos
    """
    Cin = x_ref.shape[1]
    Cout = o_ref.shape[1]
    L = H * W
    p = K // 2

    # Build the halo-padded image in VMEM.  Halos are re-zeroed every step (no
    # stale-scratch risk).  All three stores are 128-aligned on the lane axis.
    zeros_halo = jnp.zeros((Cin, PADA), jnp.float32)
    xp_ref[:, 0:PADA] = zeros_halo
    xp_ref[:, PADA + L:PADA + L + PADA] = zeros_halo
    xp_ref[:, PADA:PADA + L] = x_ref[0]

    # Hoist the (1,L)->(Cin,L) mask broadcasts; the center column (kw == p) is
    # all-ones and skipped entirely.
    masks = [jnp.broadcast_to(m_ref[kw:kw + 1, :], (Cin, L)) if kw != p else None
             for kw in range(K)]

    # Tap accumulation: K*K small MXU matmuls into an f32 accumulator.  Tap reads
    # are static-offset lane shifts of the padded scratch; vertically OOB taps
    # land in the zero halos, horizontally OOB columns are zeroed by the exact
    # f32 masks (same math as SAME zero padding).
    # TODO(synk): verify via pl.lower_as_mlir that the unaligned static lane
    #             slices stay cheap lane shifts (switch to pltpu.roll otherwise).
    base = PADA - PAD
    acc = jnp.zeros((Cout, L), jnp.float32)
    for kh in range(K):
        for kw in range(K):
            start = base + kh * W + kw
            xt = xp_ref[:, start:start + L]               # (Cin, L), f32
            if kw != p:
                xt = xt * masks[kw]                       # exact 0/1, f32 math
            acc = acc + jnp.dot(w_ref[kh * K + kw], xt.astype(w_ref.dtype),
                                preferred_element_type=jnp.float32)

    # Single lane-dense (Cout, L) store per step.
    o_ref[0] = (acc + b_ref[...]).astype(o_ref.dtype)


def mobileone_conv2d_pallas(x_nchw, w3, b2, kernel_size, *, stride=1, groups=1,
                            mxu_dtype=jnp.bfloat16):
    """x_nchw: (N, Cin, H, W); w3: (K*K, Cout, Cin); b2: (Cout, 1). Returns NCHW."""
    assert stride == 1 and groups == 1, "kernel covers stride=1, groups=1"
    assert kernel_size % 2 == 1, "MobileOne requires odd kernel_size"
    N, Cin, H, W = x_nchw.shape
    K = kernel_size
    p = K // 2
    KK, Cout, Cin_w = w3.shape
    assert KK == K * K and Cin_w == Cin
    L = H * W
    PAD = p * (W + 1)                     # flat-axis halo covering any (kh,kw) shift
    PADA = -(-PAD // 128) * 128           # round halo up to a lane-aligned slab

    x_flat = x_nchw.reshape(N, Cin, L)    # contiguous collapse of (H, W): free
    w_mxu = w3.astype(mxu_dtype)          # MXU operands; accumulation stays f32

    # Per-kw horizontal validity masks (exact 0/1 in f32).
    w_idx = jnp.arange(L, dtype=jnp.int32) % W
    kw_off = jnp.arange(K, dtype=jnp.int32)[:, None] - p
    masks = ((w_idx[None, :] + kw_off >= 0) &
             (w_idx[None, :] + kw_off < W)).astype(jnp.float32)        # (K, L)

    kern = partial(_mobileone_kernel, H=H, W=W, K=K, PAD=PAD, PADA=PADA)
    flops = 2 * N * L * Cout * K * K * Cin
    bytes_accessed = (N * Cin * L * 4
                      + K * K * Cout * Cin * jnp.dtype(mxu_dtype).itemsize
                      + Cout * 4 + K * L * 4 + N * Cout * L * 4)

    out_flat = pl.pallas_call(
        kern,
        out_shape=jax.ShapeDtypeStruct((N, Cout, L), x_nchw.dtype),
        grid=(N,),                                       # >= 2 steps: megacore-friendly
        in_specs=[
            pl.BlockSpec((1, Cin, L), lambda n: (n, 0, 0)),
            # Grid-constant operands (fetched once, kept resident).
            pl.BlockSpec((K * K, Cout, Cin), lambda n: (0, 0, 0)),
            pl.BlockSpec((Cout, 1), lambda n: (0, 0)),
            pl.BlockSpec((K, L), lambda n: (0, 0)),
        ],
        out_specs=pl.BlockSpec((1, Cout, L), lambda n: (n, 0, 0)),
        scratch_shapes=[pltpu.VMEM((Cin, PADA + L + PADA), jnp.float32)],
        compiler_params=pltpu.CompilerParams(dimension_semantics=("parallel",)),
        cost_estimate=pl.CostEstimate(flops=flops, transcendentals=0,
                                      bytes_accessed=bytes_accessed),
    )(x_flat, w_mxu, b2, masks)
    return out_flat.reshape(N, Cout, H, W)


# ----------------------------------------------------------------------------
# Parameter construction (deterministic, matches module __init__ shapes) + glue
# ----------------------------------------------------------------------------
def _fold_conv_bn(w_hwio, gamma, beta, mean, var, eps=_EPS):
    """Fold eval-mode BatchNorm into conv weight/bias (exact)."""
    scale = gamma / jnp.sqrt(var + eps)
    return w_hwio * scale[None, None, None, :], beta - mean * scale


def _embed_1x1_into_kxk(w_1x1, K):
    """Place a (1,1,Cin,Cout) kernel at the centre of a zero (K,K,Cin,Cout) kernel."""
    w = jnp.zeros((K, K) + w_1x1.shape[2:], w_1x1.dtype)
    return w.at[K // 2, K // 2].set(w_1x1[0, 0])


def make_mobileone_params(key, in_channels, out_channels, kernel_size,
                          num_conv_branches, stride=1, groups=1):
    """Build all branch params; return raw (for the reference) plus the
    reparameterized, branch-summed (w3, b2) consumed by the Pallas kernel."""
    assert stride == 1 and groups == 1, "kernel covers stride=1, groups=1"
    K, Cin, Cout = kernel_size, in_channels, out_channels
    keys = iter(jax.random.split(key, 8 * (num_conv_branches + 2)))

    def bn_params(c):
        gamma = jax.random.normal(next(keys), (c,), jnp.float32) * 0.1 + 1.0
        beta = jax.random.normal(next(keys), (c,), jnp.float32) * 0.1
        mean = jax.random.normal(next(keys), (c,), jnp.float32) * 0.1
        var = jax.random.uniform(next(keys), (c,), jnp.float32, 0.5, 1.5)
        return gamma, beta, mean, var

    raw = {"conv": [], "scale": None, "identity": None}
    w_sum = jnp.zeros((K, K, Cin, Cout), jnp.float32)
    b_sum = jnp.zeros((Cout,), jnp.float32)

    # rbr_conv branches: KxK conv (no bias) + BN
    for _ in range(num_conv_branches):
        w = jax.random.normal(next(keys), (K, K, Cin, Cout), jnp.float32) * 0.1
        bn = bn_params(Cout)
        raw["conv"].append((w, bn))
        fw, fb = _fold_conv_bn(w, *bn)
        w_sum, b_sum = w_sum + fw, b_sum + fb

    # rbr_scale branch: 1x1 conv (no bias) + BN   (exists since K > 1)
    if K > 1:
        w1 = jax.random.normal(next(keys), (1, 1, Cin, Cout), jnp.float32) * 0.1
        bn = bn_params(Cout)
        raw["scale"] = (w1, bn)
        fw, fb = _fold_conv_bn(w1, *bn)
        w_sum, b_sum = w_sum + _embed_1x1_into_kxk(fw, K), b_sum + fb

    # identity branch: identity 1x1 conv + BN   (since Cin == Cout, stride == 1)
    if Cin == Cout and stride == 1:
        w_id = jnp.eye(Cin, dtype=jnp.float32).reshape(1, 1, Cin, Cout)
        bn = bn_params(Cin)
        raw["identity"] = (w_id, bn)
        fw, fb = _fold_conv_bn(w_id, *bn)
        w_sum, b_sum = w_sum + _embed_1x1_into_kxk(fw, K), b_sum + fb

    # Reparameterized params laid out for per-tap matmuls:
    #   w3[kh*K + kw, co, ci] = w_sum[kh, kw, ci, co]
    w3 = jnp.transpose(w_sum.reshape(K * K, Cin, Cout), (0, 2, 1))   # (K*K, Cout, Cin)
    b2 = b_sum.reshape(Cout, 1)                                      # (Cout, 1)
    return raw, w3, b2


# ----------------------------------------------------------------------------
# Pure-JAX reference (mirrors the PyTorch forward, eval-mode BN, NCHW)
# ----------------------------------------------------------------------------
def _conv_nchw(x, w_hwio, padding):
    return jax.lax.conv_general_dilated(
        x, w_hwio, window_strides=(1, 1), padding=padding,
        dimension_numbers=("NCHW", "HWIO", "NCHW"))


def _bn_nchw(y, gamma, beta, mean, var, eps=_EPS):
    inv = gamma / jnp.sqrt(var + eps)
    return ((y - mean[None, :, None, None]) * inv[None, :, None, None]
            + beta[None, :, None, None])


def mobileone_reference(x_nchw, raw, K):
    p = K // 2
    convs = raw["conv"]
    w, bn = convs[0]
    out = _bn_nchw(_conv_nchw(x_nchw, w, [(p, p), (p, p)]), *bn)
    for w, bn in convs[1:]:
        out = out + _bn_nchw(_conv_nchw(x_nchw, w, [(p, p), (p, p)]), *bn)
    if raw["scale"] is not None:
        w1, bn = raw["scale"]
        out = out + _bn_nchw(_conv_nchw(x_nchw, w1, [(0, 0), (0, 0)]), *bn)
    if raw["identity"] is not None:
        w_id, bn = raw["identity"]
        out = out + _bn_nchw(_conv_nchw(x_nchw, w_id, [(0, 0), (0, 0)]), *bn)
    return out


# ----------------------------------------------------------------------------
# Main
# ----------------------------------------------------------------------------
if __name__ == "__main__":
    # Module config: MobileOneConv2d(4, 4, kernel_size=3, stride=1, groups=1,
    #                                num_conv_branches=2, identity_conv='trainable')
    N, C, H, W = 2, 4, 16, 16
    K = 3
    NUM_CONV_BRANCHES = 2

    key = jax.random.PRNGKey(0)
    k_x, k_p = jax.random.split(key)

    x_nchw = jax.random.normal(k_x, (N, C, H, W), jnp.float32)   # PyTorch layout

    raw, w3, b2 = make_mobileone_params(
        k_p, in_channels=C, out_channels=C, kernel_size=K,
        num_conv_branches=NUM_CONV_BRANCHES, stride=1, groups=1)

    ref_nchw = mobileone_reference(x_nchw, raw, K)

    # Default (performance) path: bf16 MXU operands, f32 accumulation.
    out_bf16 = mobileone_conv2d_pallas(x_nchw, w3, b2, K, mxu_dtype=jnp.bfloat16)
    out_bf16 = jax.block_until_ready(out_bf16)
    assert out_bf16.shape == (N, C, H, W)
    assert jnp.allclose(out_bf16, ref_nchw, atol=5e-2, rtol=5e-2), (
        float(jnp.max(jnp.abs(out_bf16 - ref_nchw))))

    # f32 operand path: exactness check against the f32 reference.
    out_f32 = mobileone_conv2d_pallas(x_nchw, w3, b2, K, mxu_dtype=jnp.float32)
    out_f32 = jax.block_until_ready(out_f32)
    assert jnp.allclose(out_f32, ref_nchw, atol=1e-4, rtol=1e-4), (
        float(jnp.max(jnp.abs(out_f32 - ref_nchw))))

    print("KERNEL_OK")
</pallas_src>

<mosaic_0001>
module attributes {stable_mosaic.version = 11 : i64} {
  func.func @_mobileone_kernel(%arg0: i32, %arg1: memref<1x4x256xf32, #tpu.memory_space<vmem>>, %arg2: memref<9x4x4xbf16, #tpu.memory_space<vmem>>, %arg3: memref<4x1xf32, #tpu.memory_space<vmem>>, %arg4: memref<3x256xf32, #tpu.memory_space<vmem>>, %arg5: memref<1x4x256xf32, #tpu.memory_space<vmem>>, %arg6: memref<4x512xf32, #tpu.memory_space<vmem>>) attributes {dimension_semantics = [#tpu.dimension_semantics<parallel>], iteration_bounds = array<i64: 2>, scalar_prefetch = 0 : i64, scratch_operands = 1 : i64, tpu.core_type = #tpu.core_type<tc>, window_params = [{transform_indices = @transform_0, window_bounds = array<i64: 1, 4, 256>}, {pipeline_mode = #tpu.pipeline_mode<synchronous>, transform_indices = @transform_1, window_bounds = array<i64: 9, 4, 4>}, {pipeline_mode = #tpu.pipeline_mode<synchronous>, transform_indices = @transform_2, window_bounds = array<i64: 4, 1>}, {pipeline_mode = #tpu.pipeline_mode<synchronous>, transform_indices = @transform_3, window_bounds = array<i64: 3, 256>}, {transform_indices = @transform_4, window_bounds = array<i64: 1, 4, 256>}]} {
    %cst = arith.constant 0.000000e+00 : f32
    %0 = vector.broadcast %cst : f32 to vector<4x128xf32>
    %c0 = arith.constant 0 : index
    %c0_0 = arith.constant 0 : index
    %1 = vector.load %arg6[%c0, %c0_0] : memref<4x512xf32, #tpu.memory_space<vmem>>, vector<4x128xf32>
    tpu.vector_store %arg6[%c0, %c0_0], %0 {strides = array<i32>} : memref<4x512xf32, #tpu.memory_space<vmem>>, vector<4x128xf32>,
    %c0_1 = arith.constant 0 : index
    %c384 = arith.constant 384 : index
    %2 = vector.load %arg6[%c0_1, %c384] : memref<4x512xf32, #tpu.memory_space<vmem>>, vector<4x128xf32>
    tpu.vector_store %arg6[%c0_1, %c384], %0 {strides = array<i32>} : memref<4x512xf32, #tpu.memory_space<vmem>>, vector<4x128xf32>,
    %c0_2 = arith.constant 0 : index
    %c0_3 = arith.constant 0 : index
    %c0_4 = arith.constant 0 : index
    %3 = vector.load %arg1[%c0_2, %c0_3, %c0_4] : memref<1x4x256xf32, #tpu.memory_space<vmem>>, vector<1x4x256xf32>
    %4 = vector.shape_cast %3 : vector<1x4x256xf32> to vector<4x256xf32>
    %c0_5 = arith.constant 0 : index
    %c128 = arith.constant 128 : index
    %5 = vector.load %arg6[%c0_5, %c128] : memref<4x512xf32, #tpu.memory_space<vmem>>, vector<4x256xf32>
    tpu.vector_store %arg6[%c0_5, %c128], %4 {strides = array<i32>} : memref<4x512xf32, #tpu.memory_space<vmem>>, vector<4x256xf32>,
    %c0_6 = arith.constant 0 : index
    %c0_7 = arith.constant 0 : index
    %6 = vector.load %arg4[%c0_6, %c0_7] : memref<3x256xf32, #tpu.memory_space<vmem>>, vector<1x256xf32>
    %7 = vector.shape_cast %6 : vector<1x256xf32> to vector<1x256xf32>
    %8 = vector.broadcast %7 : vector<1x256xf32> to vector<4x256xf32>
    %c2 = arith.constant 2 : index
    %c0_8 = arith.constant 0 : index
    %9 = vector.load %arg4[%c2, %c0_8] : memref<3x256xf32, #tpu.memory_space<vmem>>, vector<1x256xf32>
    %10 = vector.shape_cast %9 : vector<1x256xf32> to vector<1x256xf32>
    %11 = vector.broadcast %10 : vector<1x256xf32> to vector<4x256xf32>
    %cst_9 = arith.constant 0.000000e+00 : f32
    %12 = vector.broadcast %cst_9 : f32 to vector<4x256xf32>
    %c0_10 = arith.constant 0 : index
    %c111 = arith.constant 111 : index
    %13 = vector.load %arg6[%c0_10, %c111] : memref<4x512xf32, #tpu.memory_space<vmem>>, vector<4x256xf32>
    %14 = arith.mulf %13, %8 : vector<4x256xf32>
    %c0_11 = arith.constant 0 : index
    %c0_12 = arith.constant 0 : index
    %c0_13 = arith.constant 0 : index
    %15 = vector.load %arg2[%c0_11, %c0_12, %c0_13] : memref<9x4x4xbf16, #tpu.memory_space<vmem>>, vector<1x4x4xbf16>
    %16 = vector.shape_cast %15 : vector<1x4x4xbf16> to vector<4x4xbf16>
    %17 = arith.truncf %14 : vector<4x256xf32> to vector<4x256xbf16>
    %cst_14 = arith.constant dense<0.000000e+00> : vector<4x256xf32>
    %18 = tpu.matmul %16, %17, %cst_14 {dimension_numbers = #tpu.dot_dimension_numbers<[1], [0], [0], [1], [0, 0, 1, 1], [], []>} : vector<4x4xbf16>, vector<4x256xbf16>, vector<4x256xf32> -> vector<4x256xf32>
    %19 = arith.addf %12, %18 : vector<4x256xf32>
    %c0_15 = arith.constant 0 : index
    %c112 = arith.constant 112 : index
    %20 = vector.load %arg6[%c0_15, %c112] : memref<4x512xf32, #tpu.memory_space<vmem>>, vector<4x256xf32>
    %c1 = arith.constant 1 : index
    %c0_16 = arith.constant 0 : index
    %c0_17 = arith.constant 0 : index
    %21 = vector.load %arg2[%c1, %c0_16, %c0_17] : memref<9x4x4xbf16, #tpu.memory_space<vmem>>, vector<1x4x4xbf16>
    %22 = vector.shape_cast %21 : vector<1x4x4xbf16> to vector<4x4xbf16>
    %23 = arith.truncf %20 : vector<4x256xf32> to vector<4x256xbf16>
    %cst_18 = arith.constant dense<0.000000e+00> : vector<4x256xf32>
    %24 = tpu.matmul %22, %23, %cst_18 {dimension_numbers = #tpu.dot_dimension_numbers<[1], [0], [0], [1], [0, 0, 1, 1], [], []>} : vector<4x4xbf16>, vector<4x256xbf16>, vector<4x256xf32> -> vector<4x256xf32>
    %25 = arith.addf %19, %24 : vector<4x256xf32>
    %c0_19 = arith.constant 0 : index
    %c113 = arith.constant 113 : index
    %26 = vector.load %arg6[%c0_19, %c113] : memref<4x512xf32, #tpu.memory_space<vmem>>, vector<4x256xf32>
    %27 = arith.mulf %26, %11 : vector<4x256xf32>
    %c2_20 = arith.constant 2 : index
    %c0_21 = arith.constant 0 : index
    %c0_22 = arith.constant 0 : index
    %28 = vector.load %arg2[%c2_20, %c0_21, %c0_22] : memref<9x4x4xbf16, #tpu.memory_space<vmem>>, vector<1x4x4xbf16>
    %29 = vector.shape_cast %28 : vector<1x4x4xbf16> to vector<4x4xbf16>
    %30 = arith.truncf %27 : vector<4x256xf32> to vector<4x256xbf16>
    %cst_23 = arith.constant dense<0.000000e+00> : vector<4x256xf32>
    %31 = tpu.matmul %29, %30, %cst_23 {dimension_numbers = #tpu.dot_dimension_numbers<[1], [0], [0], [1], [0, 0, 1, 1], [], []>} : vector<4x4xbf16>, vector<4x256xbf16>, vector<4x256xf32> -> vector<4x256xf32>
    %32 = arith.addf %25, %31 : vector<4x256xf32>
    %c0_24 = arith.constant 0 : index
    %c127 = arith.constant 127 : index
    %33 = vector.load %arg6[%c0_24, %c127] : memref<4x512xf32, #tpu.memory_space<vmem>>, vector<4x256xf32>
    %34 = arith.mulf %33, %8 : vector<4x256xf32>
    %c3 = arith.constant 3 : index
    %c0_25 = arith.constant 0 : index
    %c0_26 = arith.constant 0 : index
    %35 = vector.load %arg2[%c3, %c0_25, %c0_26] : memref<9x4x4xbf16, #tpu.memory_space<vmem>>, vector<1x4x4xbf16>
    %36 = vector.shape_cast %35 : vector<1x4x4xbf16> to vector<4x4xbf16>
    %37 = arith.truncf %34 : vector<4x256xf32> to vector<4x256xbf16>
    %cst_27 = arith.constant dense<0.000000e+00> : vector<4x256xf32>
    %38 = tpu.matmul %36, %37, %cst_27 {dimension_numbers = #tpu.dot_dimension_numbers<[1], [0], [0], [1], [0, 0, 1, 1], [], []>} : vector<4x4xbf16>, vector<4x256xbf16>, vector<4x256xf32> -> vector<4x256xf32>
    %39 = arith.addf %32, %38 : vector<4x256xf32>
    %c0_28 = arith.constant 0 : index
    %c128_29 = arith.constant 128 : index
    %40 = vector.load %arg6[%c0_28, %c128_29] : memref<4x512xf32, #tpu.memory_space<vmem>>, vector<4x256xf32>
    %c4 = arith.constant 4 : index
    %c0_30 = arith.constant 0 : index
    %c0_31 = arith.constant 0 : index
    %41 = vector.load %arg2[%c4, %c0_30, %c0_31] : memref<9x4x4xbf16, #tpu.memory_space<vmem>>, vector<1x4x4xbf16>
    %42 = vector.shape_cast %41 : vector<1x4x4xbf16> to vector<4x4xbf16>
    %43 = arith.truncf %40 : vector<4x256xf32> to vector<4x256xbf16>
    %cst_32 = arith.constant dense<0.000000e+00> : vector<4x256xf32>
    %44 = tpu.matmul %42, %43, %cst_32 {dimension_numbers = #tpu.dot_dimension_numbers<[1], [0], [0], [1], [0, 0, 1, 1], [], []>} : vector<4x4xbf16>, vector<4x256xbf16>, vector<4x256xf32> -> vector<4x256xf32>
    %45 = arith.addf %39, %44 : vector<4x256xf32>
    %c0_33 = arith.constant 0 : index
    %c129 = arith.constant 129 : index
    %46 = vector.load %arg6[%c0_33, %c129] : memref<4x512xf32, #tpu.memory_space<vmem>>, vector<4x256xf32>
    %47 = arith.mulf %46, %11 : vector<4x256xf32>
    %c5 = arith.constant 5 : index
    %c0_34 = arith.constant 0 : index
    %c0_35 = arith.constant 0 : index
    %48 = vector.load %arg2[%c5, %c0_34, %c0_35] : memref<9x4x4xbf16, #tpu.memory_space<vmem>>, vector<1x4x4xbf16>
    %49 = vector.shape_cast %48 : vector<1x4x4xbf16> to vector<4x4xbf16>
    %50 = arith.truncf %47 : vector<4x256xf32> to vector<4x256xbf16>
    %cst_36 = arith.constant dense<0.000000e+00> : vector<4x256xf32>
    %51 = tpu.matmul %49, %50, %cst_36 {dimension_numbers = #tpu.dot_dimension_numbers<[1], [0], [0], [1], [0, 0, 1, 1], [], []>} : vector<4x4xbf16>, vector<4x256xbf16>, vector<4x256xf32> -> vector<4x256xf32>
    %52 = arith.addf %45, %51 : vector<4x256xf32>
    %c0_37 = arith.constant 0 : index
    %c143 = arith.constant 143 : index
    %53 = vector.load %arg6[%c0_37, %c143] : memref<4x512xf32, #tpu.memory_space<vmem>>, vector<4x256xf32>
    %54 = arith.mulf %53, %8 : vector<4x256xf32>
    %c6 = arith.constant 6 : index
    %c0_38 = arith.constant 0 : index
    %c0_39 = arith.constant 0 : index
    %55 = vector.load %arg2[%c6, %c0_38, %c0_39] : memref<9x4x4xbf16, #tpu.memory_space<vmem>>, vector<1x4x4xbf16>
    %56 = vector.shape_cast %55 : vector<1x4x4xbf16> to vector<4x4xbf16>
    %57 = arith.truncf %54 : vector<4x256xf32> to vector<4x256xbf16>
    %cst_40 = arith.constant dense<0.000000e+00> : vector<4x256xf32>
    %58 = tpu.matmul %56, %57, %cst_40 {dimension_numbers = #tpu.dot_dimension_numbers<[1], [0], [0], [1], [0, 0, 1, 1], [], []>} : vector<4x4xbf16>, vector<4x256xbf16>, vector<4x256xf32> -> vector<4x256xf32>
    %59 = arith.addf %52, %58 : vector<4x256xf32>
    %c0_41 = arith.constant 0 : index
    %c144 = arith.constant 144 : index
    %60 = vector.load %arg6[%c0_41, %c144] : memref<4x512xf32, #tpu.memory_space<vmem>>, vector<4x256xf32>
    %c7 = arith.constant 7 : index
    %c0_42 = arith.constant 0 : index
    %c0_43 = arith.constant 0 : index
    %61 = vector.load %arg2[%c7, %c0_42, %c0_43] : memref<9x4x4xbf16, #tpu.memory_space<vmem>>, vector<1x4x4xbf16>
    %62 = vector.shape_cast %61 : vector<1x4x4xbf16> to vector<4x4xbf16>
    %63 = arith.truncf %60 : vector<4x256xf32> to vector<4x256xbf16>
    %cst_44 = arith.constant dense<0.000000e+00> : vector<4x256xf32>
    %64 = tpu.matmul %62, %63, %cst_44 {dimension_numbers = #tpu.dot_dimension_numbers<[1], [0], [0], [1], [0, 0, 1, 1], [], []>} : vector<4x4xbf16>, vector<4x256xbf16>, vector<4x256xf32> -> vector<4x256xf32>
    %65 = arith.addf %59, %64 : vector<4x256xf32>
    %c0_45 = arith.constant 0 : index
    %c145 = arith.constant 145 : index
    %66 = vector.load %arg6[%c0_45, %c145] : memref<4x512xf32, #tpu.memory_space<vmem>>, vector<4x256xf32>
    %67 = arith.mulf %66, %11 : vector<4x256xf32>
    %c8 = arith.constant 8 : index
    %c0_46 = arith.constant 0 : index
    %c0_47 = arith.constant 0 : index
    %68 = vector.load %arg2[%c8, %c0_46, %c0_47] : memref<9x4x4xbf16, #tpu.memory_space<vmem>>, vector<1x4x4xbf16>
    %69 = vector.shape_cast %68 : vector<1x4x4xbf16> to vector<4x4xbf16>
    %70 = arith.truncf %67 : vector<4x256xf32> to vector<4x256xbf16>
    %cst_48 = arith.constant dense<0.000000e+00> : vector<4x256xf32>
    %71 = tpu.matmul %69, %70, %cst_48 {dimension_numbers = #tpu.dot_dimension_numbers<[1], [0], [0], [1], [0, 0, 1, 1], [], []>} : vector<4x4xbf16>, vector<4x256xbf16>, vector<4x256xf32> -> vector<4x256xf32>
    %72 = arith.addf %65, %71 : vector<4x256xf32>
    %c0_49 = arith.constant 0 : index
    %c0_50 = arith.constant 0 : index
    %73 = vector.load %arg3[%c0_49, %c0_50] : memref<4x1xf32, #tpu.memory_space<vmem>>, vector<4x1xf32>
    %74 = vector.broadcast %73 : vector<4x1xf32> to vector<4x256xf32>
    %75 = arith.addf %72, %74 : vector<4x256xf32>
    %c0_51 = arith.constant 0 : index
    %c0_52 = arith.constant 0 : index
    %c0_53 = arith.constant 0 : index
    %76 = vector.load %arg5[%c0_51, %c0_52, %c0_53] : memref<1x4x256xf32, #tpu.memory_space<vmem>>, vector<1x4x256xf32>
    %77 = vector.shape_cast %76 : vector<1x4x256xf32> to vector<4x256xf32>
    %78 = vector.shape_cast %75 : vector<4x256xf32> to vector<1x4x256xf32>
    tpu.vector_store %arg5[%c0_51, %c0_52, %c0_53], %78 {strides = array<i32>} : memref<1x4x256xf32, #tpu.memory_space<vmem>>, vector<1x4x256xf32>,
    return
  }
  func.func @transform_0(%arg0: i32) -> (i32, i32, i32) {
    %c0_i32 = arith.constant 0 : i32
    %c0_i32_0 = arith.constant 0 : i32
    %c0_i32_1 = arith.constant 0 : i32
    return %arg0, %c0_i32, %c0_i32_0 : i32, i32, i32
  }
  func.func @transform_1(%arg0: i32) -> (i32, i32, i32) {
    %c0_i32 = arith.constant 0 : i32
    %c0_i32_0 = arith.constant 0 : i32
    %c0_i32_1 = arith.constant 0 : i32
    %c0_i32_2 = arith.constant 0 : i32
    return %c0_i32, %c0_i32_0, %c0_i32_1 : i32, i32, i32
  }
  func.func @transform_2(%arg0: i32) -> (i32, i32) {
    %c0_i32 = arith.constant 0 : i32
    %c0_i32_0 = arith.constant 0 : i32
    %c0_i32_1 = arith.constant 0 : i32
    return %c0_i32, %c0_i32_0 : i32, i32
  }
  func.func @transform_3(%arg0: i32) -> (i32, i32) {
    %c0_i32 = arith.constant 0 : i32
    %c0_i32_0 = arith.constant 0 : i32
    %c0_i32_1 = arith.constant 0 : i32
    return %c0_i32, %c0_i32_0 : i32, i32
  }
  func.func @transform_4(%arg0: i32) -> (i32, i32, i32) {
    %c0_i32 = arith.constant 0 : i32
    %c0_i32_0 = arith.constant 0 : i32
    %c0_i32_1 = arith.constant 0 : i32
    return %arg0, %c0_i32, %c0_i32_0 : i32, i32, i32
  }
}

</mosaic_0001>

<bundles_post_ra>
// kernel: tpu_custom_call.1
= control target key start
LH: loop header
LB: loop body
LE: loop exit
PB: predicated region body
PF: predicated region fallthrough
CT: control target
= control target key end

     0   :  { %9 = vsyncpa [#allocation4], 0  ;;  %s1436_s0 = inlined_call_operand.vmem [shape: f32[2,4,256], index: 0, kind: input, shape index: {}]   ;;  %s1437_s1 = inlined_call_operand.vmem [shape: bf16[9,4,4], index: 1, kind: input, shape index: {}]   ;;  %s1438_s2 = inlined_call_operand.vmem [shape: f32[4,1], index: 2, kind: input, shape index: {}]   ;;  %s1439_s3 = inlined_call_operand.vmem [shape: f32[3,256], index: 3, kind: input, shape index: {}]   ;;  %s1440_s4 = inlined_call_operand.hbm [shape: f32[2,4,256], index: 4, kind: output, shape index: {}]  }
   0x1   :  { %11 = vsyncpa [#allocation4 + $0x1], 0  ;;  %s1205_s15 = smov 0   ;;  %s1207_s16 = smov 0  }
   0x2   :  { %s1209_s17 = smov 0   ;;  %s1211_s18 = smov 0  }
   0x3 LB: > { %s1226_s19 = sadd.s32 4294967295, %s1167_s18   ;;  %s1012_s20 = sadd.s32 4294967294, %s1167_s18   ;;  %s1167_s18 = sphi %s1211_s18, %s1446_s18   ;;  %s1163_s17 = sphi %s1209_s17, %s1445_s17   ;;  %s1159_s16 = sphi %s1207_s16, %s1444_s16   ;;  %s1155_s15 = sphi %s1205_s15, %s1443_s15  }
   0x4   : > { %s1230_s21 = sadd.s32 1, %s1167_s18   ;;  %s113_s22 = sadd.s32 1, %s1163_s17 }
   0x5   : > { %s110_s23 = ssub.s32 %s1167_s18, %s1230_s21  ;;  %p123_p0 = scmp.ne.s32.totalorder %s1163_s17, %s1159_s16 }
   0x6   : > { %p111_p1 = scmp.eq.s32.totalorder %s110_s23, 0  ;;  %p124_p2 = scmp.eq.s32.totalorder %s1226_s19, 1 }
   0x7   : > { %p129_p3 = scmp.ne.s32.totalorder %s1159_s16, %s1155_s15  ;;  %p130_p4 = scmp.eq.s32.totalorder %s1012_s20, 1 }
   0x8   : > { %s1241_s24 = scalar_select %p111_p1, %s1163_s17, %s113_s22  }
   0x9   : > { %p1243_p5 = por %p124_p2, %p123_p0  ;;  %p1247_p6 = por %p130_p4, %p129_p3 }
   0xa   : > { %p1015_p7 = scmp.ge.s32.totalorder %s1167_s18, 1  ;;  %p165_p8 = scmp.lt.s32.totalorder %s1167_s18, 3 }
   0xc   : > { %p166_p9 = pnand %p1015_p7, %p165_p8 }
   0xd   : > { %v203_v0 = vlaneseq (!%p166_p9)  ;;  %v1169_v1 = vmov (!%p166_p9), 0.0   ;;  %v201_v2 = vld [vmem:[%s1439_s3] ss:$4 sm:$0x3] (!%p166_p9)  ;;  %p191_p10 = scmp.lt.s32.totalorder (!%p166_p9), %s1226_s19, 1  ;;  %s1170_s10 = smov (!%p166_p9), 111  }
   0xe   : > { %169 = sbr.rel (%p166_p9) target bundleno = 538 (0x21a), region = 36  ;;  %197 = vst [vmem:[#allocation2] sm:$0xf] (!%p166_p9), %v1169_v1  ;;  %198 = vst [vmem:[#allocation2 + $0xc] sm:$0xf] (!%p166_p9), %v1169_v1  ;;  %s1171_s11 = smov (!%p166_p9), 127  }
   0xf   : > { %v204_v3 = vshrl.u32 (!%p166_p9), %v203_v0, 7  ;;  %v1019_v4 = vld [vmem:[%s1439_s3 + $0x2] ss:$4 sm:$0x3] (!%p166_p9)  ;;  %s1172_s12 = smov (!%p166_p9), 113   ;;  %s1173_s13 = smov (!%p166_p9), 1  }
  0x10   : > { %s1174_s14 = smov (!%p166_p9), 15   ;;  %s1175_s20 = smov (!%p166_p9), 17   ;;  %vm228_vm0 = vcmask (!%p166_p9), 908288   ;;  %v1177_v27 = vmov (!%p166_p9), 0   ;;  %vm381_vm1 = vcmask (!%p166_p9), 924672   ;;  %vm464_vm2 = vcmask (!%p166_p9), 1039360  }
  0x11   : > { %v205_v5 = vsub.s32 (!%p166_p9), 0, %v204_v3  ;;  %v209_v6 = vsub.s32 (!%p166_p9), 1, %v204_v3  ;;  %s1176_s22 = smov (!%p166_p9), 16   ;;  %304 = vmatprep.mubr.bf16.mxu0 (!%p166_p9), %v1177_v27  ;;  %366 = vmatprep.mubr.bf16.mxu1 (!%p166_p9), %v1177_v27  ;;  %vm487_vm3 = vcmask (!%p166_p9), 7168   ;;  %vm258_vm4 = vcmask (!%p166_p9), 130048   ;;  %s1178_s28 = smov (!%p166_p9), 112  }
  0x12   : > { %1102 = vset.pattern.permute.xlu0 (!%p166_p9), %v1177_v27  ;;  %vm265_vm5 = vcmask (!%p166_p9), 1041408   ;;  %vm404_vm6 = vcmask (!%p166_p9), 121856   ;;  %vm261_vm7 = vcmask (!%p166_p9), 31744   ;;  %v1020_v1 = vld [vmem:[%s1437_s1 + $0x2] sm:$0x3] (!%p166_p9)  ;;  %vm322_vm8 = vcmask (!%p166_p9), 138240  }
  0x13   : > { %v206_v7 = vrot.slane (!%p166_p9), %v201_v2, %v205_v5  ;;  %v210_v8 = vrot.slane (!%p166_p9), %v201_v2, %v209_v6  ;;  %v217_v9 = vrot.slane (!%p166_p9), %v1019_v4, %v205_v5  ;;  %v221_v10 = vrot.slane (!%p166_p9), %v1019_v4, %v209_v6  ;;  %s188_s30 = sand.u32 (!%p166_p9), 1, %s1159_s16  }
  0x14   : > { %vm787_vm9 = vcmask (!%p166_p9), 916480  }
  0x15   : > { %s192_s5 = scalar_select %p191_p10, %s1226_s19, 1  ;;  %v224_v11 = vcombine.low %v206_v7, %v210_v8  ;;  %v377_v13 = vcombine.low %v217_v9, %v221_v10  ;;  %v603_v2 = vld [vmem:[#allocation2 + $0xc] sm:$0xf] }
  0x16   : > { %v686_v3 = vld [vmem:[#allocation2 + $0xc] sm:$0xf] }
  0x17   : > { %s1051_s6 = sshll.u32 %s192_s5, 3  ;;  %225 = vrot.lane.b32.xlu0 %v224_v11, %s1170_s10  ;;  %461 = vrot.lane.b32.xlu1 %v224_v11, %s1171_s11  ;;  %s1016_s5 = sshll.u32 %s188_s30, 3 }
  0x18   : > { %s195_s9 = scalar_lea.vmem %s1436_s0, %s1051_s6  ;;  %s1052_s6 = sshll.u32 %s1226_s19, 7 }
  0x19   : > { %v1264_v12 = vld [vmem:[%s195_s9] sm:$0xff]  ;;  %s190_s7 = scalar_lea.vmem [#allocation3], %s1016_s5  ;;  %s1179_s19 = smov [#allocation3]  }
  0x1a   : > { %200 = vst [vmem:[#allocation2 + $0x4] sm:$0xff] %v1264_v12  ;;  %s953_s8 = sshll.u32 %s190_s7, 4  ;;  %s1396_s8 = int_to_ptr.vmem [resolvable:$true] %s953_s8 }
  0x1b   : > { %378 = vrot.lane.b32.xlu0 %v377_v13, %s1172_s12  ;;  %604 = vrot.lane.b32.xlu1 %v377_v13, %s1173_s13 }
  0x1f   : > { %687 = vrot.lane.b32.xlu0 %v224_v11, %s1174_s14  ;;  %844 = vrot.lane.b32.xlu1 %v377_v13, %s1175_s20  ;;  %v775_v13 = vpack.c.bf16 %v1264_v12, %v1264_v12 }
  0x21   : > { %v222_v14 = vld [vmem:[#allocation2] sm:$0xff]  ;;  %v223_v17 = vld [vmem:[#allocation2 + $0x8] sm:$0xf] }
  0x22   : > { %v246_v15 = vpack.c.bf16 %v222_v14, %v222_v14  ;;  %v244_v16 = vcombine.high %v222_v14, %v222_v14  ;;  %v248_v19 = vpack.c.bf16 %v223_v17, %v223_v17  ;;  %v460_v22 = vld [vmem:[#allocation2 + $0x8] sm:$0xf] }
  0x23   : > { %v376_v29 = vld [vmem:[#allocation2 + $0x8] sm:$0xf] }
  0x24   : > { %v247_v18 = vpack.c.bf16 %v244_v16, %v244_v16  ;;  %252 = vrot.lane.b32.xlu0 %v246_v15, %s1176_s22 }
  0x26   : > { %254 = vrot.lane.b32.xlu1 %v247_v18, %s1176_s22 }
  0x28   : > { %256 = vrot.lane.b32.xlu0 %v248_v19, %s1176_s22  ;;  %v769_v19 = vld [vmem:[#allocation2 + $0xc] sm:$0xf] }
  0x89   : > { %v226_v20 = vpop.permute.xlu0 %225  ;;  %v462_v21 = vpop.permute.xlu1 %461 }
  0x8a   : > { %v227_v23 = vrot.slane %v226_v20, 4  ;;  %v463_v24 = vrot.slane %v462_v21, 4 }
  0x8c   : > { %v233_v25 = vmul.f32 %v227_v23, %v223_v17  ;;  %v469_v26 = vmul.f32 %v463_v24, %v460_v22  ;;  %v229_v33 = vsel %vm228_vm0, %v227_v23, %v226_v20  ;;  %v465_v37 = vsel %vm464_vm2, %v463_v24, %v462_v21  ;;  %v843_v22 = vld [vmem:[#allocation2 + $0xc] sm:$0xf] }
  0x8d   : > { %v379_v28 = vpop.permute.xlu0 %378  ;;  %v605_v30 = vpop.permute.xlu1 %604  ;;  %v232_v40 = vmul.f32 %v229_v33, %v222_v14  ;;  %v468_v44 = vmul.f32 %v465_v37, %v222_v14  ;;  %v777_v23 = vpack.c.bf16 %v769_v19, %v769_v19 }
  0x8e   : > { %v380_v31 = vrot.slane %v379_v28, 4  ;;  %v240_v32 = vpack.c.bf16 %v233_v25, %v233_v25  ;;  %v477_v36 = vpack.c.bf16 %v469_v26, %v469_v26  ;;  %v606_v43 = vrot.slane %v605_v30, 4 }
  0x8f   : > { %v238_v49 = vpack.c.bf16 %v232_v40, %v232_v40  ;;  %v236_v50 = vcombine.high %v232_v40, %v232_v40  ;;  %v475_v54 = vpack.c.bf16 %v468_v44, %v468_v44  ;;  %v473_v0 = vcombine.high %v468_v44, %v468_v44  ;;  %v234_v40 = vld [vmem:[%s1437_s1] sm:$0x3] }
  0x90   : > { %v382_v34 = vsel %vm381_vm1, %v380_v31, %v379_v28  ;;  %v386_v35 = vmul.f32 %v380_v31, %v376_v29  ;;  %320 = vrot.lane.b32.xlu1 %v240_v32, %s1175_s20  ;;  %v608_v47 = vsel %vm487_vm3, %v606_v43, %v605_v30  ;;  %v612_v4 = vmul.f32 %v606_v43, %v603_v2 }
  0x91   : > { %v688_v38 = vpop.permute.xlu0 %687  ;;  %v1280_v39 = vpop.permute.xlu1 %844  ;;  %v385_v41 = vmul.f32 %v382_v34, %v222_v14  ;;  %v611_v53 = vmul.f32 %v608_v47, %v1264_v12  ;;  %v239_v56 = vpack.c.bf16 %v236_v50, %v236_v50  ;;  %v476_v7 = vpack.c.bf16 %v473_v0, %v473_v0 }
  0x92   : > { %v394_v42 = vpack.c.bf16 %v386_v35, %v386_v35  ;;  %v689_v51 = vrot.slane %v688_v38, 4  ;;  %v620_v9 = vpack.c.bf16 %v612_v4, %v612_v4  ;;  %v846_v11 = vrot.slane %v1280_v39, 4 }
  0x93   : > { %v392_v48 = vpack.c.bf16 %v385_v41, %v385_v41  ;;  %v390_v57 = vcombine.high %v385_v41, %v385_v41  ;;  %v618_v63 = vpack.c.bf16 %v611_v53, %v611_v53  ;;  %v616_v10 = vcombine.high %v611_v53, %v611_v53  ;;  %v1028_v53 = vld [vmem:[%s1437_s1 + $0x6] sm:$0x3] }
  0x94   : > { %402 = vrot.lane.b32.xlu0 %v394_v42, %s1174_s14  ;;  %485 = vrot.lane.b32.xlu1 %v477_v36, %s1173_s13  ;;  %v691_v60 = vsel %vm404_vm6, %v689_v51, %v688_v38  ;;  %v695_v5 = vmul.f32 %v689_v51, %v686_v3  ;;  %v773_v14 = vcombine.high %v1264_v12, %v1264_v12 }
  0x95   : > { %v694_v61 = vmul.f32 %v691_v60, %v1264_v12  ;;  %v393_v62 = vpack.c.bf16 %v390_v57, %v390_v57  ;;  %v619_v15 = vpack.c.bf16 %v616_v10, %v616_v10  ;;  %v848_v17 = vsel %vm322_vm8, %v846_v11, %v1280_v39  ;;  %v1040_v10 = vld [vmem:[%s1437_s1 + $0xe] sm:$0x3] }
  0x96   : > { %v253_v45 = vpop.permute.xlu0 %252  ;;  %v703_v8 = vpack.c.bf16 %v695_v5, %v695_v5  ;;  %v776_v18 = vpack.c.bf16 %v773_v14, %v773_v14  ;;  %v851_v20 = vmul.f32 %v848_v17, %v1264_v12  ;;  %v852_v24 = vmul.f32 %v846_v11, %v843_v22  ;;  %v925_v12 = vld [vmem:[%s1438_s2] sm:$0xf]  ;;  %v1037_v5 = vld [vmem:[%s1437_s1 + $0xc] sm:$0x3]  ;;  %v1043_v17 = vld [vmem:[%s1437_s1 + $0x10] sm:$0x3] }
  0x97   : > { %v701_v6 = vpack.c.bf16 %v694_v61, %v694_v61  ;;  %v699_v16 = vcombine.high %v694_v61, %v694_v61 }
  0x98   : > { %v255_v46 = vpop.permute.xlu1 %254  ;;  %398 = vrot.lane.b32.xlu0 %v392_v48, %s1174_s14  ;;  %316 = vrot.lane.b32.xlu1 %v238_v49, %s1175_s20  ;;  %v858_v25 = vpack.c.bf16 %v851_v20, %v851_v20  ;;  %v856_v26 = vcombine.high %v851_v20, %v851_v20  ;;  %v860_v28 = vpack.c.bf16 %v852_v24, %v852_v24  ;;  %v554_v49 = vsel %vm265_vm5, %v775_v13, 0 }
  0x99   : > { %v259_v52 = vsel %vm258_vm4, %v253_v45, %v255_v46  ;;  %v702_v21 = vpack.c.bf16 %v699_v16, %v699_v16 }
  0x9a   : > { %v257_v55 = vpop.permute.xlu0 %256  ;;  %v267_v59 = vsel %vm265_vm5, %v259_v52, 0  ;;  %v859_v29 = vpack.c.bf16 %v856_v26, %v856_v26 }
  0x9b   : > { %v260_v58 = vsel %vm258_vm4, %v255_v46, %v257_v55  ;;  %v1025_v46 = vld [vmem:[%s1437_s1 + $0x4] sm:$0x3] }
  0x9c   : > { %1021 = vmatprep.subr.msk.bf16.mxu0 %vm265_vm5, %v260_v58  ;;  %481 = vrot.lane.b32.xlu1 %v475_v54, %s1173_s13 }
  0x9d   : > { %318 = vrot.lane.b32.xlu0 %v239_v56, %s1175_s20  ;;  %273 = vmatpush1.bf16.msra.mxu0 %v267_v59  ;;  %v1031_v56 = vld [vmem:[%s1437_s1 + $0x8] sm:$0x3] }
  0xa0   : > { %400 = vrot.lane.b32.xlu1 %v393_v62, %s1174_s14  ;;  %1022 = vmatmul.mubr.msk.bf16.vlgmr.msra.gmra.mrb[0].mxu0 %vm261_vm7, %v1020_v1  ;;  %v1034_v62 = vld [vmem:[%s1437_s1 + $0xa] sm:$0x3]  ;;  %s1109_s14 = sshll.u32 %s1179_s19, 4  ;;  %s1110_s14 = int_to_ptr.vmem [resolvable:$false] %s1109_s14 }
  0xa1   : > { %624 = vrot.lane.b32.xlu0 %v618_v63, %s1171_s11  ;;  %448 = vmatprep.mubr.bf16.mxu0 %v1177_v27  ;;  %s1111_s20 = scalar_lea.vmem %s1110_s14, 256  ;;  %p1112_p0 = scmp.lt.s32.totalorder %s1396_s8, %s1110_s14 }
  0xa4   : > { %707 = vrot.lane.b32.xlu1 %v701_v6, %s1172_s12 }
  0xa5   : > { %483 = vrot.lane.b32.xlu0 %v476_v7, %s1173_s13  ;;  %s1105_s13 = scalar_lea.vmem %s1396_s8, 128 }
  0xa6   : > { %p1106_p11 = scmp.ne.s32.totalorder %s1396_s8, %s1105_s13  ;;  %p1113_p1 = scmp.lt.s32.totalorder %s1111_s20, %s1105_s13 }
  0xa8   : > { %711 = vrot.lane.b32.xlu1 %v703_v8, %s1172_s12  ;;  %p1107_p12 = pnand %p1106_p11, %p1243_p5  ;;  %p1114_p2 = por %p1113_p1, %p1112_p0 }
  0xa9   : > { %628 = vrot.lane.b32.xlu0 %v620_v9, %s1171_s11 }
  0xaa   : > { %p1108_p13 = pneg %p1107_p12 }
  0xac   : > { %626 = vrot.lane.b32.xlu1 %v619_v15, %s1171_s11  ;;  %s1394_s11 = scalar_lea.hbm %s1440_s4, %s1052_s6  ;;  %p1115_p3 = pnand %p1114_p2, %p1108_p13 }
  0xad   : > { %781 = vrot.lane.b32.xlu0 %v775_v13, %s1178_s28 }
  0xb0   : > { %783 = vrot.lane.b32.xlu1 %v776_v18, %s1178_s28 }
  0xb1   : > { %709 = vrot.lane.b32.xlu0 %v702_v21, %s1172_s12  ;;  %s939_s12 = scalar_lea.sflag [#allocation4], %s188_s30 }
  0xb4   : > { %864 = vrot.lane.b32.xlu1 %v858_v25, %s1170_s10 }
  0xb5   : > { %785 = vrot.lane.b32.xlu0 %v777_v23, %s1178_s28 }
  0xb8   : > { %868 = vrot.lane.b32.xlu1 %v860_v28, %s1170_s10 }
  0xb9   : > { %866 = vrot.lane.b32.xlu0 %v859_v29, %s1170_s10 }
  0xbd   : > { %928 = vperm.xlu0 %1102, %v925_v12  }
 0x102   : > { %v321_v30 = vpop.permute.xlu1 %320 }
 0x106   : > { %v403_v31 = vpop.permute.xlu0 %402  ;;  %v486_v32 = vpop.permute.xlu1 %485 }
 0x10a   : > { %v399_v33 = vpop.permute.xlu0 %398  ;;  %v317_v34 = vpop.permute.xlu1 %316 }
 0x10e   : > { %v482_v35 = vpop.permute.xlu1 %481 }
 0x10f   : > { %v319_v36 = vpop.permute.xlu0 %318 }
 0x110   : > { %v324_v37 = vsel %vm322_vm8, %v319_v36, %v321_v30  ;;  %v323_v38 = vsel %vm322_vm8, %v317_v34, %v319_v36 }
 0x111   : > { %1023 = vmatprep.subr.msk.bf16.mxu1 %vm265_vm5, %v324_v37  ;;  %v329_v39 = vsel %vm265_vm5, %v323_v38, 0 }
 0x112   : > { %335 = vmatpush1.bf16.msra.mxu1 %v329_v39  ;;  %v401_v41 = vpop.permute.xlu1 %400 }
 0x113   : > { %v625_v42 = vpop.permute.xlu0 %624  ;;  %v405_v43 = vsel %vm404_vm6, %v399_v33, %v401_v41  ;;  %v406_v44 = vsel %vm404_vm6, %v401_v41, %v403_v31 }
 0x114   : > { %v411_v45 = vsel %vm265_vm5, %v405_v43, 0  ;;  %1026 = vmatprep.subr.msk.bf16.mxu0 %vm265_vm5, %v406_v44 }
 0x115   : > { %1024 = vmatmul.mubr.msk.bf16.vlgmr.msra.gmra.mrb[0].mxu1 %vm261_vm7, %v234_v40  ;;  %417 = vmatpush1.bf16.msra.mxu0 %v411_v45 }
 0x116   : > { %531 = vmatprep.mubr.bf16.mxu1 %v1177_v27  ;;  %v708_v47 = vpop.permute.xlu1 %707  ;;  %1032 = vmatprep.subr.msk.bf16.mxu0 %vm265_vm5, %v776_v18 }
 0x117   : > { %v484_v48 = vpop.permute.xlu0 %483 }
 0x118   : > { %v488_v50 = vsel %vm487_vm3, %v482_v35, %v484_v48  ;;  %v489_v51 = vsel %vm487_vm3, %v484_v48, %v486_v32  ;;  %1027 = vmatmul.mubr.msk.bf16.vlgmr.msra.gmra.mrb[4].mxu0 %vm261_vm7, %v1025_v46 }
 0x119   : > { %v494_v52 = vsel %vm265_vm5, %v488_v50, 0  ;;  %1029 = vmatprep.subr.msk.bf16.mxu1 %vm265_vm5, %v489_v51  ;;  %560 = vmatpush1.bf16.msra.mxu0 %v554_v49 }
 0x11a   : > { %500 = vmatpush1.bf16.msra.mxu1 %v494_v52  ;;  %v712_v54 = vpop.permute.xlu1 %711  ;;  %591 = vmatprep.mubr.bf16.mxu0 %v1177_v27 }
 0x11b   : > { %v629_v55 = vpop.permute.xlu0 %628 }
 0x11d   : > { %1030 = vmatmul.mubr.msk.bf16.vlgmr.msra.gmra.mrb[4].mxu1 %vm261_vm7, %v1028_v53 }
 0x11e   : > { %674 = vmatprep.mubr.bf16.mxu1 %v1177_v27  ;;  %v627_v57 = vpop.permute.xlu1 %626 }
 0x11f   : > { %v782_v58 = vpop.permute.xlu0 %781  ;;  %v631_v59 = vsel %vm464_vm2, %v625_v42, %v627_v57  ;;  %v632_v60 = vsel %vm464_vm2, %v627_v57, %v629_v55 }
 0x120   : > { %v637_v61 = vsel %vm265_vm5, %v631_v59, 0  ;;  %1033 = vmatmul.mubr.msk.bf16.vlgmr.msra.gmra.mrb[8].mxu0 %vm261_vm7, %v1031_v56  ;;  %1035 = vmatprep.subr.msk.bf16.mxu1 %vm265_vm5, %v632_v60 }
 0x121   : > { %643 = vmatpush1.bf16.msra.mxu1 %v637_v61  ;;  %757 = vmatprep.mubr.bf16.mxu0 %v1177_v27 }
 0x122   : > { %v784_v63 = vpop.permute.xlu1 %783 }
 0x123   : > { %v710_v0 = vpop.permute.xlu0 %709  ;;  %v788_v4 = vsel %vm787_vm9, %v782_v58, %v784_v63 }
 0x124   : > { %v714_v1 = vsel %vm381_vm1, %v708_v47, %v710_v0  ;;  %v715_v2 = vsel %vm381_vm1, %v710_v0, %v712_v54  ;;  %v794_v9 = vsel %vm265_vm5, %v788_v4, 0 }
 0x125   : > { %v720_v3 = vsel %vm265_vm5, %v714_v1, 0  ;;  %1036 = vmatmul.mubr.msk.bf16.vlgmr.msra.gmra.mrb[8].mxu1 %vm261_vm7, %v1034_v62  ;;  %1038 = vmatprep.subr.msk.bf16.mxu0 %vm265_vm5, %v715_v2 }
 0x126   : > { %726 = vmatpush1.bf16.msra.mxu0 %v720_v3  ;;  %831 = vmatprep.mubr.bf16.mxu1 %v1177_v27  ;;  %v865_v6 = vpop.permute.xlu1 %864 }
 0x127   : > { %v786_v7 = vpop.permute.xlu0 %785 }
 0x128   : > { %v789_v8 = vsel %vm787_vm9, %v784_v63, %v786_v7 }
 0x129   : > { %1039 = vmatmul.mubr.msk.bf16.vlgmr.msra.gmra.mrb[12].mxu0 %vm261_vm7, %v1037_v5  ;;  %1041 = vmatprep.subr.msk.bf16.mxu1 %vm265_vm5, %v789_v8 }
 0x12a   : > { %800 = vmatpush1.bf16.msra.mxu1 %v794_v9  ;;  %914 = vmatprep.mubr.bf16.mxu0 %v1177_v27  ;;  %v869_v11 = vpop.permute.xlu1 %868 }
 0x12b   : > { %v867_v13 = vpop.permute.xlu0 %866 }
 0x12c   : > { %v871_v14 = vsel %vm228_vm0, %v865_v6, %v867_v13  ;;  %v872_v15 = vsel %vm228_vm0, %v867_v13, %v869_v11 }
 0x12d   : > { %v877_v16 = vsel %vm265_vm5, %v871_v14, 0  ;;  %1042 = vmatmul.mubr.msk.bf16.vlgmr.msra.gmra.mrb[12].mxu1 %vm261_vm7, %v1040_v10  ;;  %1044 = vmatprep.subr.msk.bf16.mxu0 %vm265_vm5, %v872_v15 }
 0x12e   : > { %883 = vmatpush1.bf16.msra.mxu0 %v877_v16 }
 0x131   : > { %1045 = vmatmul.mubr.msk.bf16.vlgmr.msra.gmra.mrb[16].mxu0 %vm261_vm7, %v1043_v17 }
 0x13c   : > { %v929_v0 = vpop.permute.xlu0 %928 }
 0x173   : > { %v306_v27 = vpop.f32.mrb[0].mxu0 }
 0x174   : > { %v308_v18 = vpop.f32.mrb[1].mxu0 }
 0x175   : > { %v310_v19 = vpop.f32.mrb[2].mxu0 }
 0x176   : > { %v311_v20 = vpop.f32.mrb[3].mxu0 }
 0x1e8   : > { %v368_v21 = vpop.f32.mrb[0].mxu1 }
 0x1e9   : > { %v369_v22 = vadd.f32 %v368_v21, %v306_v27  ;;  %v370_v23 = vpop.f32.mrb[1].mxu1 }
 0x1ea   : > { %v371_v24 = vadd.f32 %v370_v23, %v308_v18  ;;  %v372_v25 = vpop.f32.mrb[2].mxu1 }
 0x1eb   : > { %v373_v26 = vpop.f32.mrb[3].mxu1  ;;  %v450_v28 = vpop.f32.mrb[4].mxu0 }
 0x1ec   : > { %v457_v29 = vadd.f32 %v450_v28, %v369_v22  ;;  %v452_v12 = vpop.f32.mrb[5].mxu0 }
 0x1ed   : > { %v458_v30 = vadd.f32 %v452_v12, %v371_v24  ;;  %v454_v31 = vpop.f32.mrb[6].mxu0 }
 0x1ee   : > { %v455_v32 = vpop.f32.mrb[7].mxu0 }
 0x1f0   : > { %v533_v33 = vpop.f32.mrb[4].mxu1 }
 0x1f1   : > { %v540_v34 = vadd.f32 %v533_v33, %v457_v29  ;;  %v535_v35 = vpop.f32.mrb[5].mxu1 }
 0x1f2   : > { %v541_v36 = vadd.f32 %v535_v35, %v458_v30  ;;  %v537_v37 = vpop.f32.mrb[6].mxu1 }
 0x1f3   : > { %v538_v38 = vpop.f32.mrb[7].mxu1  ;;  %v593_v39 = vpop.f32.mrb[8].mxu0 }
 0x1f4   : > { %v600_v40 = vadd.f32 %v593_v39, %v540_v34  ;;  %v595_v41 = vpop.f32.mrb[9].mxu0 }
 0x1f5   : > { %v601_v42 = vadd.f32 %v595_v41, %v541_v36  ;;  %v597_v43 = vpop.f32.mrb[10].mxu0 }
 0x1f6   : > { %v598_v44 = vpop.f32.mrb[11].mxu0 }
 0x1f8   : > { %v676_v45 = vpop.f32.mrb[8].mxu1 }
 0x1f9   : > { %v683_v46 = vadd.f32 %v676_v45, %v600_v40  ;;  %v678_v47 = vpop.f32.mrb[9].mxu1 }
 0x1fa   : > { %v684_v48 = vadd.f32 %v678_v47, %v601_v42  ;;  %v680_v49 = vpop.f32.mrb[10].mxu1 }
 0x1fb   : > { %v681_v50 = vpop.f32.mrb[11].mxu1 }
 0x1fc   : > { %v759_v51 = vpop.f32.mrb[12].mxu0 }
 0x1fd   : > { %v766_v52 = vadd.f32 %v759_v51, %v683_v46  ;;  %v761_v53 = vpop.f32.mrb[13].mxu0 }
 0x1fe   : > { %v767_v54 = vadd.f32 %v761_v53, %v684_v48  ;;  %v763_v55 = vpop.f32.mrb[14].mxu0 }
 0x1ff   : > { %v764_v56 = vpop.f32.mrb[15].mxu0 }
 0x200   : > { %v833_v57 = vpop.f32.mrb[12].mxu1 }
 0x201   : > { %v840_v58 = vadd.f32 %v833_v57, %v766_v52  ;;  %v835_v59 = vpop.f32.mrb[13].mxu1 }
 0x202   : > { %v841_v60 = vadd.f32 %v835_v59, %v767_v54  ;;  %v837_v61 = vpop.f32.mrb[14].mxu1 }
 0x203   : > { %v838_v62 = vpop.f32.mrb[15].mxu1 }
 0x204   : > { %v916_v63 = vpop.f32.mrb[16].mxu0 }
 0x205   : > { %v923_v1 = vadd.f32 %v916_v63, %v840_v58  ;;  %v918_v2 = vpop.f32.mrb[17].mxu0 }
 0x206   : > { %v924_v3 = vadd.f32 %v918_v2, %v841_v60  ;;  %v920_v4 = vpop.f32.mrb[18].mxu0 }
 0x207   : > { %v931_v5 = vadd.f32 %v929_v0, %v923_v1  ;;  %v921_v6 = vpop.f32.mrb[19].mxu0 }
 0x208   : > { %v932_v7 = vadd.f32 %v929_v0, %v924_v3 }
 0x20a   : > { %v935_v8 = vcombine.low %v931_v5, %v932_v7 }
 0x20c   : > { %937 = vst [vmem:[%s190_s7] sm:$0xff] %v935_v8 }
 0x20d   : > { %1118 = shalt.err (!%p1115_p3)
}
 0x20e   : > { %s1119_s22 = scalar_lea.hbm %s1394_s11, 128  ;;  %s1123_s28 = scalar_lea.hbm %s1440_s4, 256 }
 0x20f   : > { %p1120_p4 = scmp.ne.s32.totalorder %s1394_s11, %s1119_s22  ;;  %p1124_p9 = scmp.lt.u32.totalorder %s1394_s11, %s1440_s4 }
 0x210   : > { %p1125_p10 = scmp.lt.u32.totalorder %s1123_s28, %s1119_s22  ;;  %p1127_p12 = scmp.lt.u32.totalorder %s1119_s22, %s1394_s11 }
 0x211   : > { %p1121_p7 = pnand %p1120_p4, %p1243_p5 }
 0x212   : > { %p1126_p11 = por %p1125_p10, %p1124_p9 }
 0x213   : > { %p1122_p8 = pneg %p1121_p7 }
 0x214   : > { %p1128_p13 = por %p1127_p12, %p1126_p11 }
 0x216   : > { %p1129_p0 = pnand %p1128_p13, %p1122_p8 }
 0x218   : > { %1132 = shalt.err (!%p1129_p0)
}
 0x219   : > { %1053 = dma.vmem_to_hbm [thread:$0]  (%p1243_p5), %s1396_s8, 128, %s1394_s11, %s939_s12  }
 0x21a PF: > { %p1059_p1 = scmp.ge.s32.totalorder %s1167_s18, 2  ;;  %s965_s5 = sand.u32 1, %s1155_s15  }
 0x21b   : > { %s966_s6 = scalar_lea.sflag [#allocation4], %s965_s5 }
 0x21c   : > { %p1056_p2 = pnand %p1059_p1, %p1247_p6 }
 0x21e   : > { %1150 = dma.done.wait (!%p1056_p2), %s966_s6, 128  }
 0x21f   : > { %1152 = vsyncadd (!%p1056_p2), %s966_s6, 4294967168  ;;  %p14_p3 = scmp.ge.s32.totalorder %s1230_s21, 4   ;;  %s1443_s15 = smov %s1159_s16 }
 0x220   : > { %s1444_s16 = smov %s1163_s17  ;;  %s1445_s17 = smov %s1241_s24 }
 0x221   : > { %s1446_s18 = smov %s1230_s21  ;;  %16 = sbr.rel (!%p14_p3) target bundleno = 3 (0x3), region = 80 }
 0x228   :  { %971 = vsyncpa [#allocation4], 1 }
 0x229   :  { %973 = vsyncpa [#allocation4 + $0x1], 1 }

</bundles_post_ra>
